<compile_context>
chip_gen: v7x
topology: tpu7x:2x2x1
jax: 0.10.0
libtpu: 0.0.40
codegen_flags: <defaults>
</compile_context>

<pallas_src>
import functools

import jax
import jax.numpy as jnp
from jax.experimental import pallas as pl
from jax.experimental.pallas import tpu as pltpu


# ----------------------------------------------------------------------------
# Fused decoder-step kernel (embedding gather + all LSTM layers + fc_out)
# ----------------------------------------------------------------------------
def make_decoder_kernel(n_layers, hidden_dim, vocab, batch):
    """Kernel signature:

      kernel(tok, emb_table, h_in, c_in,
             w_cat_0, b_0, ..., w_cat_{L-1}, b_{L-1},
             w_fc, b_fc,
             pred_out, h_out, c_out)

    tok       : (batch, 1)            int32  token ids
    emb_table : (vocab, emb)          bf16   embedding table
    h_in      : (L, batch, H)         f32    previous hidden states
    c_in      : (L, batch, H)         f32    previous cell states
    w_cat_l   : (in_size_l + H, 4H)   bf16   [w_ih ; w_hh], gate cols [i,f,o,g]
    b_l       : (1, 4H)               f32    b_ih + b_hh, gate cols [i,f,o,g]
    w_fc      : (H, vocab)            bf16   output projection (pre-transposed)
    b_fc      : (1, vocab)            f32
    pred      : (batch, vocab)        f32
    h_out     : (L, batch, H)         f32    (aliased with h_in)
    c_out     : (L, batch, H)         f32    (aliased with c_in)
    """
    H = hidden_dim

    def kernel(tok_ref, emb_ref, h_in_ref, c_in_ref, *rest):
        layer_w = []
        idx = 0
        for _ in range(n_layers):
            layer_w.append((rest[idx], rest[idx + 1]))
            idx += 2
        w_fc_ref, b_fc_ref = rest[idx], rest[idx + 1]
        pred_ref, h_out_ref, c_out_ref = rest[idx + 2], rest[idx + 3], rest[idx + 4]

        # ---- Embedding lookup fused as a one-hot MXU matmul (exact gather).
        toks = tok_ref[...]                                        # (batch, 1) i32
        vocab_iota = jax.lax.broadcasted_iota(jnp.int32, (batch, vocab), 1)
        one_hot = (vocab_iota == toks).astype(jnp.bfloat16)        # (batch, vocab)
        # 1.0 is exact in bf16 and each row sums exactly one product, so the
        # result equals the bf16 embedding row exactly.
        x = jnp.dot(one_hot, emb_ref[...],
                    preferred_element_type=jnp.float32).astype(jnp.bfloat16)
        # TODO(synk): dropout(embedded) is identity (eval mode).

        # ---- Stacked LSTM layers (statically unrolled, one step).
        for l in range(n_layers):
            w_cat_ref, b_ref = layer_w[l]
            h_prev = h_in_ref[l]                                   # (batch, H) f32
            c_prev = c_in_ref[l]                                   # (batch, H) f32

            # Single K=(in+H) matmul per layer: fills the 256-wide MXU in one
            # pass on v6e/v7x and removes the partial-gates add.
            x_cat = jnp.concatenate([x, h_prev.astype(jnp.bfloat16)], axis=1)
            gates = (
                jnp.dot(x_cat, w_cat_ref[...],
                        preferred_element_type=jnp.float32)
                + b_ref[...]
            )                                                      # (batch, 4H) f32

            # Gate columns are pre-permuted to [i, f, o | g]: one sigmoid over
            # the contiguous 3H block, one tanh over the trailing H block.
            sig = jax.nn.sigmoid(gates[:, 0:3 * H])                # (batch, 3H)
            i_g = sig[:, 0 * H:1 * H]
            f_g = sig[:, 1 * H:2 * H]
            o_g = sig[:, 2 * H:3 * H]
            g_g = jnp.tanh(gates[:, 3 * H:4 * H])

            c_new = f_g * c_prev + i_g * g_g                       # f32
            h_new = o_g * jnp.tanh(c_new)                          # f32

            h_out_ref[l] = h_new                                   # written once
            c_out_ref[l] = c_new
            x = h_new.astype(jnp.bfloat16)                         # feed next layer

        # ---- fc_out on the last layer's output (== output.squeeze(0)).
        pred_ref[...] = (
            jnp.dot(x, w_fc_ref[...], preferred_element_type=jnp.float32)
            + b_fc_ref[...]
        )

    return kernel


def decoder_forward(tokens, hidden, cell, params, n_layers):
    """tokens: (batch,) int32 -> (prediction (batch, vocab),
                                  hidden (L, batch, H), cell (L, batch, H))."""
    batch = tokens.shape[0]
    H = hidden.shape[-1]
    vocab = params["w_fc"].shape[-1]

    tok2d = tokens.reshape(batch, 1).astype(jnp.int32)

    args = [tok2d, params["embedding"], hidden, cell]
    for l in range(n_layers):
        args += [params[f"w_cat_{l}"], params[f"b_{l}"]]
    args += [params["w_fc"], params["b_fc"]]

    vmem_spec = functools.partial(pl.BlockSpec,
                                  memory_space=pltpu.MemorySpace.VMEM)
    out_shape = (
        jax.ShapeDtypeStruct((batch, vocab), jnp.float32),
        jax.ShapeDtypeStruct(hidden.shape, jnp.float32),
        jax.ShapeDtypeStruct(cell.shape, jnp.float32),
    )

    return pl.pallas_call(
        make_decoder_kernel(n_layers, H, vocab, batch),
        out_shape=out_shape,
        in_specs=[vmem_spec() for _ in args],
        out_specs=tuple(vmem_spec() for _ in range(3)),
        # hidden -> h_out, cell -> c_out update the existing state buffers.
        input_output_aliases={2: 1, 3: 2},
    )(*args)


# ----------------------------------------------------------------------------
# Pure-JAX reference (same bf16-operand / f32-accumulate numerics & layout)
# ----------------------------------------------------------------------------
def decoder_reference(tokens, hidden, cell, params, n_layers, hidden_dim):
    H = hidden_dim
    x = params["embedding"][tokens]                                # bf16 (batch, emb)
    h_list, c_list = [], []
    for l in range(n_layers):
        w_cat = params[f"w_cat_{l}"]
        b = params[f"b_{l}"]
        h_prev, c_prev = hidden[l], cell[l]
        x_cat = jnp.concatenate([x, h_prev.astype(jnp.bfloat16)], axis=1)
        gates = jnp.dot(x_cat, w_cat, preferred_element_type=jnp.float32) + b
        i_g = jax.nn.sigmoid(gates[:, 0 * H:1 * H])
        f_g = jax.nn.sigmoid(gates[:, 1 * H:2 * H])
        o_g = jax.nn.sigmoid(gates[:, 2 * H:3 * H])
        g_g = jnp.tanh(gates[:, 3 * H:4 * H])
        c_new = f_g * c_prev + i_g * g_g
        h_new = o_g * jnp.tanh(c_new)
        h_list.append(h_new)
        c_list.append(c_new)
        x = h_new.astype(jnp.bfloat16)
    pred = (jnp.dot(x, params["w_fc"], preferred_element_type=jnp.float32)
            + params["b_fc"])
    return pred, jnp.stack(h_list, 0), jnp.stack(c_list, 0)


# ----------------------------------------------------------------------------
# Deterministic parameter construction
# ----------------------------------------------------------------------------
def _permute_gate_cols(w):
    """Reorder the last (4H) axis from PyTorch [i, f, g, o] to [i, f, o, g]."""
    H = w.shape[-1] // 4
    i = w[..., 0 * H:1 * H]
    f = w[..., 1 * H:2 * H]
    g = w[..., 2 * H:3 * H]
    o = w[..., 3 * H:4 * H]
    return jnp.concatenate([i, f, o, g], axis=-1)


def make_params(key, output_dim, embedding_dim, hidden_dim, n_layers):
    params = {}
    k_emb, key = jax.random.split(key)
    # bf16 embedding table: halves its DMA/VMEM footprint; gathers are exact.
    params["embedding"] = jax.random.normal(
        k_emb, (output_dim, embedding_dim), jnp.float32).astype(jnp.bfloat16)

    scale = 1.0 / float(hidden_dim) ** 0.5
    for l in range(n_layers):
        in_size = embedding_dim if l == 0 else hidden_dim
        k1, k2, k3, k4, key = jax.random.split(key, 5)
        # PyTorch layout: weight_ih_l (4H, in), weight_hh_l (4H, H); stored here
        # pre-transposed, pre-concatenated [w_ih ; w_hh] and gate-permuted.
        w_ih = jax.random.uniform(
            k1, (in_size, 4 * hidden_dim), jnp.float32, -scale, scale)
        w_hh = jax.random.uniform(
            k2, (hidden_dim, 4 * hidden_dim), jnp.float32, -scale, scale)
        b_ih = jax.random.uniform(k3, (4 * hidden_dim,), jnp.float32, -scale, scale)
        b_hh = jax.random.uniform(k4, (4 * hidden_dim,), jnp.float32, -scale, scale)
        w_cat = jnp.concatenate([w_ih, w_hh], axis=0)            # (in+H, 4H)
        params[f"w_cat_{l}"] = _permute_gate_cols(w_cat).astype(jnp.bfloat16)
        params[f"b_{l}"] = _permute_gate_cols(b_ih + b_hh)[None, :]  # (1,4H) f32

    k5, k6, key = jax.random.split(key, 3)
    params["w_fc"] = jax.random.uniform(
        k5, (hidden_dim, output_dim), jnp.float32, -scale, scale
    ).astype(jnp.bfloat16)
    params["b_fc"] = jax.random.uniform(
        k6, (output_dim,), jnp.float32, -scale, scale)[None, :]  # (1, vocab) f32
    return params


if __name__ == "__main__":
    # Small, lane/sublane-aligned shapes consistent with the Decoder module.
    OUTPUT_DIM = 256      # vocab size (lane-dense fc_out output)
    EMBEDDING_DIM = 128
    HIDDEN_DIM = 128      # gate slices are full (8,128) tiles
    N_LAYERS = 2
    BATCH = 8             # fills the sublanes

    key = jax.random.PRNGKey(0)
    k_tok, k_h, k_c, k_params = jax.random.split(key, 4)
    tokens = jax.random.randint(k_tok, (BATCH,), 0, OUTPUT_DIM, jnp.int32)
    hidden0 = 0.1 * jax.random.normal(
        k_h, (N_LAYERS, BATCH, HIDDEN_DIM), jnp.float32)
    cell0 = 0.1 * jax.random.normal(
        k_c, (N_LAYERS, BATCH, HIDDEN_DIM), jnp.float32)
    params = make_params(k_params, OUTPUT_DIM, EMBEDDING_DIM, HIDDEN_DIM, N_LAYERS)

    # Reference first (the kernel output aliases fresh copies internally; this
    # just keeps ordering unambiguous).
    pred_ref, h_ref, c_ref = decoder_reference(
        tokens, hidden0, cell0, params, N_LAYERS, HIDDEN_DIM)

    fwd = jax.jit(functools.partial(decoder_forward, n_layers=N_LAYERS))
    pred, h_out, c_out = fwd(tokens, hidden0, cell0, params)
    jax.block_until_ready((pred, h_out, c_out))

    assert pred.shape == (BATCH, OUTPUT_DIM)
    assert h_out.shape == (N_LAYERS, BATCH, HIDDEN_DIM)
    assert c_out.shape == (N_LAYERS, BATCH, HIDDEN_DIM)
    assert jnp.allclose(pred, pred_ref, atol=2e-4, rtol=2e-4)
    assert jnp.allclose(h_out, h_ref, atol=2e-4, rtol=2e-4)
    assert jnp.allclose(c_out, c_ref, atol=2e-4, rtol=2e-4)

    print("KERNEL_OK")
</pallas_src>

<mosaic_0001>
module attributes {stable_mosaic.version = 11 : i64} {
  func.func @kernel(%arg0: memref<8x1xi32, #tpu.memory_space<vmem>>, %arg1: memref<256x128xbf16, #tpu.memory_space<vmem>>, %arg2: memref<2x8x128xf32, #tpu.memory_space<vmem>>, %arg3: memref<2x8x128xf32, #tpu.memory_space<vmem>>, %arg4: memref<256x512xbf16, #tpu.memory_space<vmem>>, %arg5: memref<1x512xf32, #tpu.memory_space<vmem>>, %arg6: memref<256x512xbf16, #tpu.memory_space<vmem>>, %arg7: memref<1x512xf32, #tpu.memory_space<vmem>>, %arg8: memref<128x256xbf16, #tpu.memory_space<vmem>>, %arg9: memref<1x256xf32, #tpu.memory_space<vmem>>, %arg10: memref<8x256xf32, #tpu.memory_space<vmem>>, %arg11: memref<2x8x128xf32, #tpu.memory_space<vmem>>, %arg12: memref<2x8x128xf32, #tpu.memory_space<vmem>>) attributes {dimension_semantics = [], scalar_prefetch = 0 : i64, scratch_operands = 0 : i64, tpu.core_type = #tpu.core_type<tc>} {
    %c0 = arith.constant 0 : index
    %c0_0 = arith.constant 0 : index
    %0 = vector.load %arg0[%c0, %c0_0] : memref<8x1xi32, #tpu.memory_space<vmem>>, vector<8x1xi32>
    %1 = tpu.iota {dimensions = array<i32: 1>} : vector<8x256xi32>
    %2 = vector.broadcast %0 : vector<8x1xi32> to vector<8x256xi32>
    %3 = arith.cmpi eq, %1, %2 : vector<8x256xi32>
    %4 = arith.extui %3 : vector<8x256xi1> to vector<8x256xi32>
    %5 = arith.sitofp %4 : vector<8x256xi32> to vector<8x256xf32>
    %6 = arith.truncf %5 : vector<8x256xf32> to vector<8x256xbf16>
    %c0_1 = arith.constant 0 : index
    %c0_2 = arith.constant 0 : index
    %7 = vector.load %arg1[%c0_1, %c0_2] : memref<256x128xbf16, #tpu.memory_space<vmem>>, vector<256x128xbf16>
    %cst = arith.constant dense<0.000000e+00> : vector<8x128xf32>
    %8 = tpu.matmul %6, %7, %cst {dimension_numbers = #tpu.dot_dimension_numbers<[1], [0], [0], [1], [0, 0, 1, 1], [], []>} : vector<8x256xbf16>, vector<256x128xbf16>, vector<8x128xf32> -> vector<8x128xf32>
    %9 = arith.truncf %8 : vector<8x128xf32> to vector<8x128xbf16>
    %c0_3 = arith.constant 0 : index
    %c0_4 = arith.constant 0 : index
    %c0_5 = arith.constant 0 : index
    %10 = vector.load %arg2[%c0_3, %c0_4, %c0_5] : memref<2x8x128xf32, #tpu.memory_space<vmem>>, vector<1x8x128xf32>
    %11 = vector.shape_cast %10 : vector<1x8x128xf32> to vector<8x128xf32>
    %c0_6 = arith.constant 0 : index
    %c0_7 = arith.constant 0 : index
    %c0_8 = arith.constant 0 : index
    %12 = vector.load %arg3[%c0_6, %c0_7, %c0_8] : memref<2x8x128xf32, #tpu.memory_space<vmem>>, vector<1x8x128xf32>
    %13 = vector.shape_cast %12 : vector<1x8x128xf32> to vector<8x128xf32>
    %14 = arith.truncf %11 : vector<8x128xf32> to vector<8x128xbf16>
    %15 = tpu.concatenate %9, %14 in 1 : vector<8x128xbf16>, vector<8x128xbf16> -> vector<8x256xbf16>
    %c0_9 = arith.constant 0 : index
    %c0_10 = arith.constant 0 : index
    %16 = vector.load %arg4[%c0_9, %c0_10] : memref<256x512xbf16, #tpu.memory_space<vmem>>, vector<256x512xbf16>
    %cst_11 = arith.constant dense<0.000000e+00> : vector<8x512xf32>
    %17 = tpu.matmul %15, %16, %cst_11 {dimension_numbers = #tpu.dot_dimension_numbers<[1], [0], [0], [1], [0, 0, 1, 1], [], []>} : vector<8x256xbf16>, vector<256x512xbf16>, vector<8x512xf32> -> vector<8x512xf32>
    %c0_12 = arith.constant 0 : index
    %c0_13 = arith.constant 0 : index
    %18 = vector.load %arg5[%c0_12, %c0_13] : memref<1x512xf32, #tpu.memory_space<vmem>>, vector<1x512xf32>
    %19 = vector.broadcast %18 : vector<1x512xf32> to vector<8x512xf32>
    %20 = arith.addf %17, %19 : vector<8x512xf32>
    %21 = vector.extract_strided_slice %20 {offsets = [0, 0], sizes = [8, 384], strides = [1, 1]} : vector<8x512xf32> to vector<8x384xf32>
    %22 = arith.negf %21 : vector<8x384xf32>
    %23 = math.exp %22 : vector<8x384xf32>
    %cst_14 = arith.constant 1.000000e+00 : f32
    %24 = vector.broadcast %cst_14 : f32 to vector<8x384xf32>
    %25 = arith.addf %24, %23 : vector<8x384xf32>
    %26 = arith.divf %24, %25 : vector<8x384xf32>
    %27 = vector.extract_strided_slice %26 {offsets = [0, 0], sizes = [8, 128], strides = [1, 1]} : vector<8x384xf32> to vector<8x128xf32>
    %28 = vector.extract_strided_slice %26 {offsets = [0, 128], sizes = [8, 128], strides = [1, 1]} : vector<8x384xf32> to vector<8x128xf32>
    %29 = vector.extract_strided_slice %26 {offsets = [0, 256], sizes = [8, 128], strides = [1, 1]} : vector<8x384xf32> to vector<8x128xf32>
    %30 = vector.extract_strided_slice %20 {offsets = [0, 384], sizes = [8, 128], strides = [1, 1]} : vector<8x512xf32> to vector<8x128xf32>
    %31 = math.tanh %30 : vector<8x128xf32>
    %32 = arith.mulf %28, %13 : vector<8x128xf32>
    %33 = arith.mulf %27, %31 : vector<8x128xf32>
    %34 = arith.addf %32, %33 : vector<8x128xf32>
    %35 = math.tanh %34 : vector<8x128xf32>
    %36 = arith.mulf %29, %35 : vector<8x128xf32>
    %c0_15 = arith.constant 0 : index
    %c0_16 = arith.constant 0 : index
    %c0_17 = arith.constant 0 : index
    %37 = vector.load %arg11[%c0_15, %c0_16, %c0_17] : memref<2x8x128xf32, #tpu.memory_space<vmem>>, vector<1x8x128xf32>
    %38 = vector.shape_cast %37 : vector<1x8x128xf32> to vector<8x128xf32>
    %39 = vector.shape_cast %36 : vector<8x128xf32> to vector<1x8x128xf32>
    tpu.vector_store %arg11[%c0_15, %c0_16, %c0_17], %39 {strides = array<i32>} : memref<2x8x128xf32, #tpu.memory_space<vmem>>, vector<1x8x128xf32>,
    %c0_18 = arith.constant 0 : index
    %c0_19 = arith.constant 0 : index
    %c0_20 = arith.constant 0 : index
    %40 = vector.load %arg12[%c0_18, %c0_19, %c0_20] : memref<2x8x128xf32, #tpu.memory_space<vmem>>, vector<1x8x128xf32>
    %41 = vector.shape_cast %40 : vector<1x8x128xf32> to vector<8x128xf32>
    %42 = vector.shape_cast %34 : vector<8x128xf32> to vector<1x8x128xf32>
    tpu.vector_store %arg12[%c0_18, %c0_19, %c0_20], %42 {strides = array<i32>} : memref<2x8x128xf32, #tpu.memory_space<vmem>>, vector<1x8x128xf32>,
    %43 = arith.truncf %36 : vector<8x128xf32> to vector<8x128xbf16>
    %c1 = arith.constant 1 : index
    %c0_21 = arith.constant 0 : index
    %c0_22 = arith.constant 0 : index
    %44 = vector.load %arg2[%c1, %c0_21, %c0_22] : memref<2x8x128xf32, #tpu.memory_space<vmem>>, vector<1x8x128xf32>
    %45 = vector.shape_cast %44 : vector<1x8x128xf32> to vector<8x128xf32>
    %c1_23 = arith.constant 1 : index
    %c0_24 = arith.constant 0 : index
    %c0_25 = arith.constant 0 : index
    %46 = vector.load %arg3[%c1_23, %c0_24, %c0_25] : memref<2x8x128xf32, #tpu.memory_space<vmem>>, vector<1x8x128xf32>
    %47 = vector.shape_cast %46 : vector<1x8x128xf32> to vector<8x128xf32>
    %48 = arith.truncf %45 : vector<8x128xf32> to vector<8x128xbf16>
    %49 = tpu.concatenate %43, %48 in 1 : vector<8x128xbf16>, vector<8x128xbf16> -> vector<8x256xbf16>
    %c0_26 = arith.constant 0 : index
    %c0_27 = arith.constant 0 : index
    %50 = vector.load %arg6[%c0_26, %c0_27] : memref<256x512xbf16, #tpu.memory_space<vmem>>, vector<256x512xbf16>
    %cst_28 = arith.constant dense<0.000000e+00> : vector<8x512xf32>
    %51 = tpu.matmul %49, %50, %cst_28 {dimension_numbers = #tpu.dot_dimension_numbers<[1], [0], [0], [1], [0, 0, 1, 1], [], []>} : vector<8x256xbf16>, vector<256x512xbf16>, vector<8x512xf32> -> vector<8x512xf32>
    %c0_29 = arith.constant 0 : index
    %c0_30 = arith.constant 0 : index
    %52 = vector.load %arg7[%c0_29, %c0_30] : memref<1x512xf32, #tpu.memory_space<vmem>>, vector<1x512xf32>
    %53 = vector.broadcast %52 : vector<1x512xf32> to vector<8x512xf32>
    %54 = arith.addf %51, %53 : vector<8x512xf32>
    %55 = vector.extract_strided_slice %54 {offsets = [0, 0], sizes = [8, 384], strides = [1, 1]} : vector<8x512xf32> to vector<8x384xf32>
    %56 = arith.negf %55 : vector<8x384xf32>
    %57 = math.exp %56 : vector<8x384xf32>
    %cst_31 = arith.constant 1.000000e+00 : f32
    %58 = vector.broadcast %cst_31 : f32 to vector<8x384xf32>
    %59 = arith.addf %58, %57 : vector<8x384xf32>
    %60 = arith.divf %58, %59 : vector<8x384xf32>
    %61 = vector.extract_strided_slice %60 {offsets = [0, 0], sizes = [8, 128], strides = [1, 1]} : vector<8x384xf32> to vector<8x128xf32>
    %62 = vector.extract_strided_slice %60 {offsets = [0, 128], sizes = [8, 128], strides = [1, 1]} : vector<8x384xf32> to vector<8x128xf32>
    %63 = vector.extract_strided_slice %60 {offsets = [0, 256], sizes = [8, 128], strides = [1, 1]} : vector<8x384xf32> to vector<8x128xf32>
    %64 = vector.extract_strided_slice %54 {offsets = [0, 384], sizes = [8, 128], strides = [1, 1]} : vector<8x512xf32> to vector<8x128xf32>
    %65 = math.tanh %64 : vector<8x128xf32>
    %66 = arith.mulf %62, %47 : vector<8x128xf32>
    %67 = arith.mulf %61, %65 : vector<8x128xf32>
    %68 = arith.addf %66, %67 : vector<8x128xf32>
    %69 = math.tanh %68 : vector<8x128xf32>
    %70 = arith.mulf %63, %69 : vector<8x128xf32>
    %c1_32 = arith.constant 1 : index
    %c0_33 = arith.constant 0 : index
    %c0_34 = arith.constant 0 : index
    %71 = vector.load %arg11[%c1_32, %c0_33, %c0_34] : memref<2x8x128xf32, #tpu.memory_space<vmem>>, vector<1x8x128xf32>
    %72 = vector.shape_cast %71 : vector<1x8x128xf32> to vector<8x128xf32>
    %73 = vector.shape_cast %70 : vector<8x128xf32> to vector<1x8x128xf32>
    tpu.vector_store %arg11[%c1_32, %c0_33, %c0_34], %73 {strides = array<i32>} : memref<2x8x128xf32, #tpu.memory_space<vmem>>, vector<1x8x128xf32>,
    %c1_35 = arith.constant 1 : index
    %c0_36 = arith.constant 0 : index
    %c0_37 = arith.constant 0 : index
    %74 = vector.load %arg12[%c1_35, %c0_36, %c0_37] : memref<2x8x128xf32, #tpu.memory_space<vmem>>, vector<1x8x128xf32>
    %75 = vector.shape_cast %74 : vector<1x8x128xf32> to vector<8x128xf32>
    %76 = vector.shape_cast %68 : vector<8x128xf32> to vector<1x8x128xf32>
    tpu.vector_store %arg12[%c1_35, %c0_36, %c0_37], %76 {strides = array<i32>} : memref<2x8x128xf32, #tpu.memory_space<vmem>>, vector<1x8x128xf32>,
    %77 = arith.truncf %70 : vector<8x128xf32> to vector<8x128xbf16>
    %c0_38 = arith.constant 0 : index
    %c0_39 = arith.constant 0 : index
    %78 = vector.load %arg8[%c0_38, %c0_39] : memref<128x256xbf16, #tpu.memory_space<vmem>>, vector<128x256xbf16>
    %cst_40 = arith.constant dense<0.000000e+00> : vector<8x256xf32>
    %79 = tpu.matmul %77, %78, %cst_40 {dimension_numbers = #tpu.dot_dimension_numbers<[1], [0], [0], [1], [0, 0, 1, 1], [], []>} : vector<8x128xbf16>, vector<128x256xbf16>, vector<8x256xf32> -> vector<8x256xf32>
    %c0_41 = arith.constant 0 : index
    %c0_42 = arith.constant 0 : index
    %80 = vector.load %arg9[%c0_41, %c0_42] : memref<1x256xf32, #tpu.memory_space<vmem>>, vector<1x256xf32>
    %81 = vector.broadcast %80 : vector<1x256xf32> to vector<8x256xf32>
    %82 = arith.addf %79, %81 : vector<8x256xf32>
    %c0_43 = arith.constant 0 : index
    %c0_44 = arith.constant 0 : index
    %83 = vector.load %arg10[%c0_43, %c0_44] : memref<8x256xf32, #tpu.memory_space<vmem>>, vector<8x256xf32>
    tpu.vector_store %arg10[%c0_43, %c0_44], %82 {strides = array<i32>} : memref<8x256xf32, #tpu.memory_space<vmem>>, vector<8x256xf32>,
    return
  }
}

</mosaic_0001>

<bundles_post_ra>
// kernel: decoder_forward.1
= control target key start
LH: loop header
LB: loop body
LE: loop exit
PB: predicated region body
PF: predicated region fallthrough
CT: control target
= control target key end

     0   :  { %18 = vsyncpa [#allocation3], 0  ;;  %s2484_s0 = inlined_call_operand.vmem [shape: s32[8,1], index: 0, kind: input, shape index: {}]   ;;  %s2485_s1 = inlined_call_operand.hbm [shape: bf16[256,128], index: 1, kind: input, shape index: {}]   ;;  %s2486_s2 = inlined_call_operand.hbm [shape: f32[2,8,128], index: 2, kind: input, shape index: {}, may-alias: {2,11}]   ;;  %s2487_s3 = inlined_call_operand.hbm [shape: f32[2,8,128], index: 3, kind: input, shape index: {}, may-alias: {3,12}]   ;;  %s2488_s4 = inlined_call_operand.hbm [shape: bf16[256,512], index: 4, kind: input, shape index: {}]   ;;  %s2489_s5 = inlined_call_operand.vmem [shape: f32[1,512], index: 5, kind: input, shape index: {}]   ;;  %s2490_s6 = inlined_call_operand.hbm [shape: bf16[256,512], index: 6, kind: input, shape index: {}]   ;;  %s2491_s7 = inlined_call_operand.vmem [shape: f32[1,512], index: 7, kind: input, shape index: {}]   ;;  %s2492_s8 = inlined_call_operand.hbm [shape: bf16[128,256], index: 8, kind: input, shape index: {}]   ;;  %s2493_s9 = inlined_call_operand.vmem [shape: f32[1,256], index: 9, kind: input, shape index: {}]   ;;  %s2494_s10 = inlined_call_operand.hbm [shape: f32[8,256], index: 10, kind: output, shape index: {0}]   ;;  %s2495_s11 = inlined_call_operand.hbm [shape: f32[2,8,128], index: 11, kind: output, shape index: {1}, may-alias: {2,11}]   ;;  %s2496_s12 = inlined_call_operand.hbm [shape: f32[2,8,128], index: 12, kind: output, shape index: {2}, may-alias: {3,12}]  }
   0x1   :  { %19 = vsyncpa [#allocation6], 0 }
   0x2   :  { %20 = vsyncpa [#allocation9], 0 }
   0x3   :  { %21 = vsyncpa [#allocation12], 0 }
   0x4   :  { %22 = vsyncpa [#allocation4], 0 }
   0x5   :  { %23 = vsyncpa [#allocation15], 0  ;;  %s2233_s21 = smov [#allocation5]   ;;  %s2023_s25 = scalar_lea.hbm %s2486_s2, 256 }
   0x6   :  { %s43_s22 = sshll.u32 %s2233_s21, 4  ;;  %p2024_p0 = scmp.ne.s32.totalorder %s2486_s2, %s2023_s25  ;;  %s44_s22 = int_to_ptr.vmem [resolvable:$true] %s43_s22 }
   0x7   :  { %p2027_p1 = scmp.lt.u32.totalorder %s2023_s25, %s2486_s2 }
   0x9   :  { %p2029_p2 = pnand %p2027_p1, %p2024_p0 }
   0xb   :  { %2032 = shalt.err (!%p2029_p2)
}
   0xc   :  { %s2033_s30 = scalar_lea.vmem %s44_s22, 256  ;;  %p2038_p4 = scmp.lt.s32.totalorder %s44_s22, %s44_s22 }
   0xd   :  { %p2034_p3 = scmp.ne.s32.totalorder %s44_s22, %s2033_s30  ;;  %p2039_p5 = scmp.lt.s32.totalorder %s2033_s30, %s2033_s30 }
   0xf   :  { %p2040_p6 = por %p2039_p5, %p2038_p4 }
  0x11   :  { %p2041_p7 = pnand %p2040_p6, %p2034_p3 }
  0x13   :  { %2044 = shalt.err (!%p2041_p7)
}
  0x14   :  { %s2234_s13 = smov 128   ;;  %s2235_s14 = smov 8  }
  0x15   :  { %49 = dma.hbm_to_vmem [thread:$0]  %s2486_s2, 256, %s44_s22, [#allocation6], %s2234_s13, %s2234_s13, %s2235_s14  }
  0x16   :  { %s2236_s17 = smov [#allocation8]   ;;  %s2045_s21 = scalar_lea.hbm %s2488_s4, 8192 }
  0x17   :  { %s67_s18 = sshll.u32 %s2236_s17, 4  ;;  %p2046_p8 = scmp.ne.s32.totalorder %s2488_s4, %s2045_s21  ;;  %s68_s18 = int_to_ptr.vmem [resolvable:$true] %s67_s18 }
  0x18   :  { %p2049_p9 = scmp.lt.u32.totalorder %s2045_s21, %s2488_s4 }
  0x1a   :  { %p2051_p10 = pnand %p2049_p9, %p2046_p8 }
  0x1c   :  { %2054 = shalt.err (!%p2051_p10)
}
  0x1d   :  { %s2055_s27 = scalar_lea.vmem %s68_s18, 8192  ;;  %p2060_p12 = scmp.lt.s32.totalorder %s68_s18, %s68_s18 }
  0x1e   :  { %p2056_p11 = scmp.ne.s32.totalorder %s68_s18, %s2055_s27  ;;  %p2061_p13 = scmp.lt.s32.totalorder %s2055_s27, %s2055_s27 }
  0x20   :  { %p2062_p0 = por %p2061_p13, %p2060_p12 }
  0x22   :  { %p2063_p1 = pnand %p2062_p0, %p2056_p11 }
  0x24   :  { %2066 = shalt.err (!%p2063_p1)
}
  0x25   :  { %s2237_s2 = smov 256   ;;  %s2238_s22 = smov 16  }
  0x26   :  { %73 = dma.hbm_to_vmem [thread:$0]  %s2488_s4, 8192, %s68_s18, [#allocation9], %s2237_s2, %s2237_s2, %s2238_s22  }
  0x27   :  { %s2239_s30 = smov [#allocation2]   ;;  %s2067_s19 = scalar_lea.hbm %s2485_s1, 2048 }
  0x28   :  { %s31_s15 = sshll.u32 %s2239_s30, 4  ;;  %p2068_p2 = scmp.ne.s32.totalorder %s2485_s1, %s2067_s19  ;;  %s32_s15 = int_to_ptr.vmem [resolvable:$true] %s31_s15 }
  0x29   :  { %p2071_p3 = scmp.lt.u32.totalorder %s2067_s19, %s2485_s1 }
  0x2b   :  { %p2073_p4 = pnand %p2071_p3, %p2068_p2 }
  0x2d   :  { %2076 = shalt.err (!%p2073_p4)
}
  0x2e   :  { %s2077_s25 = scalar_lea.vmem %s32_s15, 2048  ;;  %p2082_p6 = scmp.lt.s32.totalorder %s32_s15, %s32_s15 }
  0x2f   :  { %p2078_p5 = scmp.ne.s32.totalorder %s32_s15, %s2077_s25  ;;  %p2083_p7 = scmp.lt.s32.totalorder %s2077_s25, %s2077_s25 }
  0x31   :  { %p2084_p8 = por %p2083_p7, %p2082_p6 }
  0x33   :  { %p2085_p9 = pnand %p2084_p8, %p2078_p5 }
  0x35   :  { %2088 = shalt.err (!%p2085_p9)
}
  0x36   :  { %s2240_s4 = smov 64   ;;  %s2241_s18 = smov 4  }
  0x37   :  { %37 = dma.hbm_to_vmem [thread:$0]  %s2485_s1, 2048, %s32_s15, [#allocation3], %s2240_s4, %s2240_s4, %s2241_s18  }
  0x38   :  { %s2242_s28 = smov [#allocation7]   ;;  %s2243_s30 = smov [#allocation10]  }
  0x39   :  { %s55_s29 = sshll.u32 %s2242_s28, 4  ;;  %s81_s16 = sshll.u32 %s2243_s30, 4  ;;  %s56_s29 = int_to_ptr.vmem [resolvable:$true] %s55_s29  ;;  %s82_s16 = int_to_ptr.vmem [resolvable:$true] %s81_s16 }
  0x3a   :  { %s2089_s20 = scalar_lea.hbm %s2487_s3, 256 }
  0x3b   :  { %p2090_p10 = scmp.ne.s32.totalorder %s2487_s3, %s2089_s20  ;;  %p2093_p11 = scmp.lt.u32.totalorder %s2089_s20, %s2487_s3 }
  0x3d   :  { %p2095_p12 = pnand %p2093_p11, %p2090_p10 }
  0x3f   :  { %2098 = shalt.err (!%p2095_p12)
}
  0x40   :  { %s2099_s1 = scalar_lea.vmem %s56_s29, 256  ;;  %p2104_p0 = scmp.lt.s32.totalorder %s56_s29, %s56_s29 }
  0x41   :  { %p2100_p13 = scmp.ne.s32.totalorder %s56_s29, %s2099_s1  ;;  %p2105_p1 = scmp.lt.s32.totalorder %s2099_s1, %s2099_s1 }
  0x43   :  { %p2106_p2 = por %p2105_p1, %p2104_p0 }
  0x45   :  { %p2107_p3 = pnand %p2106_p2, %p2100_p13 }
  0x47   :  { %2110 = shalt.err (!%p2107_p3)
}
  0x48   :  { %61 = dma.hbm_to_vmem [thread:$0]  %s2487_s3, 256, %s56_s29, [#allocation6], %s2234_s13, %s2234_s13, %s2235_s14  }
  0x49   :  { %s2111_s27 = scalar_lea.hbm %s2490_s6, 8192 }
  0x4a   :  { %p2112_p4 = scmp.ne.s32.totalorder %s2490_s6, %s2111_s27  ;;  %p2115_p5 = scmp.lt.u32.totalorder %s2111_s27, %s2490_s6 }
  0x4c   :  { %p2117_p6 = pnand %p2115_p5, %p2112_p4 }
  0x4e   :  { %2120 = shalt.err (!%p2117_p6)
}
  0x4f   :  { %s2121_s20 = scalar_lea.vmem %s82_s16, 8192  ;;  %p2126_p8 = scmp.lt.s32.totalorder %s82_s16, %s82_s16 }
  0x50   :  { %p2122_p7 = scmp.ne.s32.totalorder %s82_s16, %s2121_s20  ;;  %p2127_p9 = scmp.lt.s32.totalorder %s2121_s20, %s2121_s20 }
  0x52   :  { %p2128_p10 = por %p2127_p9, %p2126_p8 }
  0x54   :  { %p2129_p11 = pnand %p2128_p10, %p2122_p7 }
  0x56   :  { %2132 = shalt.err (!%p2129_p11)
}
  0x57   :  { %87 = dma.hbm_to_vmem [thread:$0]  %s2490_s6, 8192, %s82_s16, [#allocation9], %s2237_s2, %s2237_s2, %s2238_s22  }
  0x58   :  { %s2244_s21 = smov [#allocation11]   ;;  %s2133_s1 = scalar_lea.hbm %s2492_s8, 2048 }
  0x59   :  { %s95_s23 = sshll.u32 %s2244_s21, 4  ;;  %p2134_p12 = scmp.ne.s32.totalorder %s2492_s8, %s2133_s1  ;;  %s96_s23 = int_to_ptr.vmem [resolvable:$true] %s95_s23 }
  0x5a   :  { %p2137_p13 = scmp.lt.u32.totalorder %s2133_s1, %s2492_s8 }
  0x5c   :  { %p2139_p0 = pnand %p2137_p13, %p2134_p12 }
  0x5e   :  { %2142 = shalt.err (!%p2139_p0)
}
  0x5f   :  { %s2143_s27 = scalar_lea.vmem %s96_s23, 2048  ;;  %p2148_p2 = scmp.lt.s32.totalorder %s96_s23, %s96_s23 }
  0x60   :  { %p2144_p1 = scmp.ne.s32.totalorder %s96_s23, %s2143_s27  ;;  %p2149_p3 = scmp.lt.s32.totalorder %s2143_s27, %s2143_s27 }
  0x62   :  { %p2150_p4 = por %p2149_p3, %p2148_p2 }
  0x64   :  { %p2151_p5 = pnand %p2150_p4, %p2144_p1 }
  0x66   :  { %2154 = shalt.err (!%p2151_p5)
}
  0x67   :  { %101 = dma.hbm_to_vmem [thread:$0]  %s2492_s8, 2048, %s96_s23, [#allocation12], %s2234_s13, %s2234_s13, %s2235_s14  }
  0x68   :  { %2221 = dma.done.wait [#allocation3], 2048  }
  0x69   :  { %2222 = vsyncadd [#allocation3], 4294965248 }
  0x6a   :  { %2223 = dma.done.wait [#allocation6], 512  }
  0x6b   :  { %2224 = vsyncadd [#allocation6], 4294966784 }
  0x6c   :  { %2225 = dma.done.wait [#allocation9], 16384  }
  0x6d   :  { %2226 = vsyncadd [#allocation9], 4294950912 }
  0x6e   :  { %2227 = dma.done.wait [#allocation12], 2048  }
  0x6f   :  { %2228 = vsyncadd [#allocation12], 4294965248  ;;  %v2245_v0 = vmov 0   ;;  %v123_v1 = vld [vmem:[%s2484_s0] sm:$0xff]  ;;  %v1761_v4 = vld [vmem:[#allocation2 + $0x48] sm:$0xff]   ;;  %v124_v49 = vlaneseq }
  0x70   :  { %1758 = vset.pattern.permute.xlu0 %v2245_v0  ;;  %v1759_v2 = vld [vmem:[#allocation2 + $0x40] sm:$0xff]   ;;  %v1762_v5 = vld [vmem:[#allocation2 + $0x8] sm:$0xff]   ;;  %v1763_v6 = vld [vmem:[#allocation2 + $0x50] sm:$0xff]   ;;  %v2246_v55 = vmov 1.0|1.0  }
  0x71   :  { %128 = vperm.xlu0 %1758, %v123_v1   ;;  %v1760_v3 = vld [vmem:[#allocation2] sm:$0xff]   ;;  %1719 = vmatprep.subr.bf16.mxu0 %v1759_v2  ;;  %v1764_v7 = vld [vmem:[#allocation2 + $0x10] sm:$0xff]   ;;  %v1765_v8 = vld [vmem:[#allocation2 + $0x58] sm:$0xff]   ;;  %v125_v50 = vand.u32 127, %v124_v49 }
  0x72   :  { %1720 = vmatpush3.bf16.msra.mxu0 %v1760_v3  ;;  %v1766_v9 = vld [vmem:[#allocation2 + $0x18] sm:$0xff]   ;;  %v1767_v10 = vld [vmem:[#allocation2 + $0x60] sm:$0xff]   ;;  %v1769_v12 = vld [vmem:[#allocation2 + $0x68] sm:$0xff]  }
  0x73   :  { %1721 = vmatprep.subr.bf16.mxu0 %v1761_v4  ;;  %v1768_v11 = vld [vmem:[#allocation2 + $0x20] sm:$0xff]   ;;  %v1770_v16 = vld [vmem:[#allocation2 + $0x28] sm:$0xff]   ;;  %v1771_v17 = vld [vmem:[#allocation2 + $0x70] sm:$0xff]   ;;  %v126_v51 = vadd.s32 128, %v125_v50 }
  0x74   :  { %v1775_v13 = vld [vmem:[#allocation8 + $0x4] ss:$16 sps:$4 sm:$0xff]   ;;  %v1780_v14 = vld [vmem:[#allocation8] ss:$16 sps:$4 sm:$0xff]   ;;  %v1773_v21 = vld [vmem:[#allocation2 + $0x78] sm:$0xff]  }
  0x75   :  { %716 = vmatprep.subr.bf16.mxu1 %v1775_v13  ;;  %v1781_v15 = vld [vmem:[#allocation8 + $0x24] ss:$16 sps:$4 sm:$0xff]   ;;  %v1786_v18 = vld [vmem:[#allocation8 + $0x20] ss:$16 sps:$4 sm:$0xff]   ;;  %v1774_v24 = vld [vmem:[#allocation2 + $0x38] sm:$0xff]  }
  0x76   :  { %1722 = vmatpush3.bf16.msra.mxu0 %v1762_v5  ;;  %717 = vmatpush1.bf16.msra.mxu1 %v1780_v14  ;;  %v1787_v19 = vld [vmem:[#allocation8 + $0x44] ss:$16 sps:$4 sm:$0xff]   ;;  %v1792_v22 = vld [vmem:[#allocation8 + $0x40] ss:$16 sps:$4 sm:$0xff]   ;;  %v1779_v26 = vld [vmem:[#allocation8 + $0xc] ss:$16 sps:$4 sm:$0xff]  }
  0x77   :  { %1723 = vmatprep.subr.bf16.mxu0 %v1763_v6  ;;  %718 = vmatprep.subr.bf16.mxu1 %v1781_v15  ;;  %v1772_v20 = vld [vmem:[#allocation2 + $0x30] sm:$0xff]   ;;  %v1777_v53 = vld [vmem:[#allocation8 + $0x8] ss:$16 sps:$4 sm:$0xff]   ;;  %v1785_v54 = vld [vmem:[#allocation8 + $0x2c] ss:$16 sps:$4 sm:$0xff]  }
  0x78   :  { %v1793_v23 = vld [vmem:[#allocation8 + $0x64] ss:$16 sps:$4 sm:$0xff]   ;;  %v1798_v25 = vld [vmem:[#allocation8 + $0x60] ss:$16 sps:$4 sm:$0xff]   ;;  %v1783_v56 = vld [vmem:[#allocation8 + $0x28] ss:$16 sps:$4 sm:$0xff]  }
  0x79   :  { %v1799_v27 = vld [vmem:[#allocation8 + $0x84] ss:$16 sps:$4 sm:$0xff]   ;;  %v1804_v28 = vld [vmem:[#allocation8 + $0x80] ss:$16 sps:$4 sm:$0xff]   ;;  %v1791_v57 = vld [vmem:[#allocation8 + $0x4c] ss:$16 sps:$4 sm:$0xff]  }
  0x7a   :  { %1724 = vmatpush3.bf16.msra.mxu0 %v1764_v7  ;;  %719 = vmatpush1.bf16.msra.mxu1 %v1786_v18  ;;  %v1805_v29 = vld [vmem:[#allocation8 + $0xa4] ss:$16 sps:$4 sm:$0xff]   ;;  %v1810_v30 = vld [vmem:[#allocation8 + $0xa0] ss:$16 sps:$4 sm:$0xff]   ;;  %v1789_v58 = vld [vmem:[#allocation8 + $0x48] ss:$16 sps:$4 sm:$0xff]  }
  0x7b   :  { %1725 = vmatprep.subr.bf16.mxu0 %v1765_v8  ;;  %720 = vmatprep.subr.bf16.mxu1 %v1787_v19  ;;  %v1811_v31 = vld [vmem:[#allocation8 + $0xc4] ss:$16 sps:$4 sm:$0xff]   ;;  %v1816_v32 = vld [vmem:[#allocation8 + $0xc0] ss:$16 sps:$4 sm:$0xff]   ;;  %v1797_v59 = vld [vmem:[#allocation8 + $0x6c] ss:$16 sps:$4 sm:$0xff]  }
  0x7c   :  { %v1817_v33 = vld [vmem:[#allocation8 + $0xe4] ss:$16 sps:$4 sm:$0xff]   ;;  %v1822_v34 = vld [vmem:[#allocation8 + $0xe0] ss:$16 sps:$4 sm:$0xff]   ;;  %v1795_v60 = vld [vmem:[#allocation8 + $0x68] ss:$16 sps:$4 sm:$0xff]  }
  0x7d   :  { %v1823_v35 = vld [vmem:[#allocation8 + $0x104] ss:$16 sps:$4 sm:$0xff]   ;;  %v1828_v36 = vld [vmem:[#allocation8 + $0x100] ss:$16 sps:$4 sm:$0xff]   ;;  %v1803_v61 = vld [vmem:[#allocation8 + $0x8c] ss:$16 sps:$4 sm:$0xff]  }
  0x7e   :  { %1726 = vmatpush3.bf16.msra.mxu0 %v1766_v9  ;;  %721 = vmatpush1.bf16.msra.mxu1 %v1792_v22  ;;  %v1829_v37 = vld [vmem:[#allocation8 + $0x124] ss:$16 sps:$4 sm:$0xff]   ;;  %v1834_v38 = vld [vmem:[#allocation8 + $0x120] ss:$16 sps:$4 sm:$0xff]   ;;  %v1801_v62 = vld [vmem:[#allocation8 + $0x88] ss:$16 sps:$4 sm:$0xff]  }
  0x7f   :  { %1727 = vmatprep.subr.bf16.mxu0 %v1767_v10  ;;  %722 = vmatprep.subr.bf16.mxu1 %v1793_v23  ;;  %v1835_v39 = vld [vmem:[#allocation8 + $0x144] ss:$16 sps:$4 sm:$0xff]   ;;  %v1840_v40 = vld [vmem:[#allocation8 + $0x140] ss:$16 sps:$4 sm:$0xff]   ;;  %v1809_v63 = vld [vmem:[#allocation8 + $0xac] ss:$16 sps:$4 sm:$0xff]  }
  0x80   :  { %v1841_v41 = vld [vmem:[#allocation8 + $0x164] ss:$16 sps:$4 sm:$0xff]   ;;  %v1846_v42 = vld [vmem:[#allocation8 + $0x160] ss:$16 sps:$4 sm:$0xff]   ;;  %v1807_v1 = vld [vmem:[#allocation8 + $0xa8] ss:$16 sps:$4 sm:$0xff]  }
  0x81   :  { %v1847_v43 = vld [vmem:[#allocation8 + $0x184] ss:$16 sps:$4 sm:$0xff]   ;;  %v1852_v44 = vld [vmem:[#allocation8 + $0x180] ss:$16 sps:$4 sm:$0xff]   ;;  %v1815_v2 = vld [vmem:[#allocation8 + $0xcc] ss:$16 sps:$4 sm:$0xff]  }
  0x82   :  { %1728 = vmatpush3.bf16.msra.mxu0 %v1768_v11  ;;  %723 = vmatpush1.bf16.msra.mxu1 %v1798_v25  ;;  %v1853_v45 = vld [vmem:[#allocation8 + $0x1a4] ss:$16 sps:$4 sm:$0xff]   ;;  %v1858_v46 = vld [vmem:[#allocation8 + $0x1a0] ss:$16 sps:$4 sm:$0xff]   ;;  %v1813_v3 = vld [vmem:[#allocation8 + $0xc8] ss:$16 sps:$4 sm:$0xff]  }
  0x83   :  { %1729 = vmatprep.subr.bf16.mxu0 %v1769_v12  ;;  %724 = vmatprep.subr.bf16.mxu1 %v1799_v27  ;;  %v1859_v47 = vld [vmem:[#allocation8 + $0x1c4] ss:$16 sps:$4 sm:$0xff]   ;;  %v1864_v48 = vld [vmem:[#allocation8 + $0x1c0] ss:$16 sps:$4 sm:$0xff]   ;;  %v1821_v4 = vld [vmem:[#allocation8 + $0xec] ss:$16 sps:$4 sm:$0xff]  }
  0x84   :  { %v1819_v5 = vld [vmem:[#allocation8 + $0xe8] ss:$16 sps:$4 sm:$0xff]   ;;  %v1827_v6 = vld [vmem:[#allocation8 + $0x10c] ss:$16 sps:$4 sm:$0xff]   ;;  %v1870_v23 = vld [vmem:[#allocation8 + $0x1e0] ss:$16 sps:$4 sm:$0xff]  }
  0x85   :  { %v1825_v7 = vld [vmem:[#allocation8 + $0x108] ss:$16 sps:$4 sm:$0xff]   ;;  %v1833_v8 = vld [vmem:[#allocation8 + $0x12c] ss:$16 sps:$4 sm:$0xff]  }
  0x86   :  { %1730 = vmatpush3.bf16.msra.mxu0 %v1770_v16  ;;  %725 = vmatpush1.bf16.msra.mxu1 %v1804_v28  ;;  %v1831_v9 = vld [vmem:[#allocation8 + $0x128] ss:$16 sps:$4 sm:$0xff]   ;;  %v1839_v10 = vld [vmem:[#allocation8 + $0x14c] ss:$16 sps:$4 sm:$0xff]  }
  0x87   :  { %1731 = vmatprep.subr.bf16.mxu0 %v1771_v17  ;;  %726 = vmatprep.subr.bf16.mxu1 %v1805_v29  ;;  %v1837_v11 = vld [vmem:[#allocation8 + $0x148] ss:$16 sps:$4 sm:$0xff]   ;;  %v1845_v12 = vld [vmem:[#allocation8 + $0x16c] ss:$16 sps:$4 sm:$0xff]  }
  0x88   :  { %v1843_v13 = vld [vmem:[#allocation8 + $0x168] ss:$16 sps:$4 sm:$0xff]   ;;  %v1851_v14 = vld [vmem:[#allocation8 + $0x18c] ss:$16 sps:$4 sm:$0xff]  }
  0x89   :  { %v1849_v15 = vld [vmem:[#allocation8 + $0x188] ss:$16 sps:$4 sm:$0xff]   ;;  %v1857_v16 = vld [vmem:[#allocation8 + $0x1ac] ss:$16 sps:$4 sm:$0xff]  }
  0x8a   :  { %1732 = vmatpush3.bf16.msra.mxu0 %v1772_v20  ;;  %727 = vmatpush1.bf16.msra.mxu1 %v1810_v30  ;;  %v1855_v17 = vld [vmem:[#allocation8 + $0x1a8] ss:$16 sps:$4 sm:$0xff]   ;;  %v1863_v18 = vld [vmem:[#allocation8 + $0x1cc] ss:$16 sps:$4 sm:$0xff]   ;;  %v1865_v20 = vld [vmem:[#allocation8 + $0x1e4] ss:$16 sps:$4 sm:$0xff]  }
  0x8b   :  { %1733 = vmatprep.subr.bf16.mxu0 %v1773_v21  ;;  %728 = vmatprep.subr.bf16.mxu1 %v1811_v31  ;;  %v1861_v19 = vld [vmem:[#allocation8 + $0x1c8] ss:$16 sps:$4 sm:$0xff]   ;;  %v1869_v21 = vld [vmem:[#allocation8 + $0x1ec] ss:$16 sps:$4 sm:$0xff]  }
  0x8c   :  { %v1867_v22 = vld [vmem:[#allocation8 + $0x1e8] ss:$16 sps:$4 sm:$0xff]   ;;  %v1876_v27 = vld [vmem:[#allocation10 + $0xc] ss:$16 sps:$4 sm:$0xff]  }
  0x8e   :  { %1734 = vmatpush3.bf16.msra.mxu0 %v1774_v24  ;;  %729 = vmatpush1.bf16.msra.mxu1 %v1816_v32  ;;  %v307_v24 = vld [vmem:[#allocation5] sm:$0xff] }
  0x8f   :  { %757 = vmatprep.subr.bf16.mxu0 %v1779_v26  ;;  %730 = vmatprep.subr.bf16.mxu1 %v1817_v33  ;;  %v309_v25 = vpack.c.bf16 %v307_v24, %v307_v24  ;;  %v1873_v26 = vld [vmem:[#allocation10 + $0x4] ss:$16 sps:$4 sm:$0xff]   ;;  %v1871_v33 = vld [vmem:[#allocation10] ss:$16 sps:$4 sm:$0xff]   ;;  %v1952_v24 = vld [vmem:[#allocation10 + $0x1a8] ss:$16 sps:$4 sm:$0xff]  }
  0x91   :  { %748 = vmatprep.mubr.bf16.mxu1 %v309_v25 }
  0x92   :  { %731 = vmatpush1.bf16.msra.mxu1 %v1822_v34  ;;  %v1874_v34 = vld [vmem:[#allocation10 + $0x8] ss:$16 sps:$4 sm:$0xff]  }
  0x93   :  { %732 = vmatprep.subr.bf16.mxu1 %v1823_v35 }
  0x96   :  { %733 = vmatpush1.bf16.msra.mxu1 %v1828_v36  ;;  %v1879_v36 = vld [vmem:[#allocation10 + $0x24] ss:$16 sps:$4 sm:$0xff]  }
  0x97   :  { %734 = vmatprep.subr.bf16.mxu1 %v1829_v37  ;;  %v1882_v37 = vld [vmem:[#allocation10 + $0x2c] ss:$16 sps:$4 sm:$0xff]  }
  0x9a   :  { %735 = vmatpush1.bf16.msra.mxu1 %v1834_v38  ;;  %v1877_v38 = vld [vmem:[#allocation10 + $0x20] ss:$16 sps:$4 sm:$0xff]  }
  0x9b   :  { %736 = vmatprep.subr.bf16.mxu1 %v1835_v39  ;;  %v1880_v39 = vld [vmem:[#allocation10 + $0x28] ss:$16 sps:$4 sm:$0xff]  }
  0x9e   :  { %737 = vmatpush1.bf16.msra.mxu1 %v1840_v40  ;;  %v1885_v40 = vld [vmem:[#allocation10 + $0x44] ss:$16 sps:$4 sm:$0xff]  }
  0x9f   :  { %738 = vmatprep.subr.bf16.mxu1 %v1841_v41  ;;  %v1888_v41 = vld [vmem:[#allocation10 + $0x4c] ss:$16 sps:$4 sm:$0xff]  }
  0xa2   :  { %739 = vmatpush1.bf16.msra.mxu1 %v1846_v42  ;;  %v1883_v42 = vld [vmem:[#allocation10 + $0x40] ss:$16 sps:$4 sm:$0xff]  }
  0xa3   :  { %740 = vmatprep.subr.bf16.mxu1 %v1847_v43  ;;  %v1886_v43 = vld [vmem:[#allocation10 + $0x48] ss:$16 sps:$4 sm:$0xff]  }
  0xa6   :  { %741 = vmatpush1.bf16.msra.mxu1 %v1852_v44  ;;  %v1891_v44 = vld [vmem:[#allocation10 + $0x64] ss:$16 sps:$4 sm:$0xff]  }
  0xa7   :  { %742 = vmatprep.subr.bf16.mxu1 %v1853_v45  ;;  %v1894_v45 = vld [vmem:[#allocation10 + $0x6c] ss:$16 sps:$4 sm:$0xff]  }
  0xaa   :  { %743 = vmatpush1.bf16.msra.mxu1 %v1858_v46  ;;  %v1889_v46 = vld [vmem:[#allocation10 + $0x60] ss:$16 sps:$4 sm:$0xff]  }
  0xab   :  { %744 = vmatprep.subr.bf16.mxu1 %v1859_v47  ;;  %v1892_v47 = vld [vmem:[#allocation10 + $0x68] ss:$16 sps:$4 sm:$0xff]  }
  0xae   :  { %745 = vmatpush1.bf16.msra.mxu1 %v1864_v48  ;;  %v1897_v48 = vld [vmem:[#allocation10 + $0x84] ss:$16 sps:$4 sm:$0xff]  }
  0xaf   :  { %746 = vmatprep.subr.bf16.mxu1 %v1865_v20  ;;  %v1943_v20 = vld [vmem:[#allocation10 + $0x180] ss:$16 sps:$4 sm:$0xff]  }
  0xb2   :  { %747 = vmatpush1.bf16.msra.mxu1 %v1870_v23  ;;  %v1951_v23 = vld [vmem:[#allocation10 + $0x1a4] ss:$16 sps:$4 sm:$0xff]  }
  0xb3   :  { %1236 = vmatprep.subr.bf16.mxu1 %v1873_v26  ;;  %v1957_v26 = vld [vmem:[#allocation10 + $0x1c4] ss:$16 sps:$4 sm:$0xff]  }
  0xf0   :  { %v129_v52 = vpop.permute.xlu0 %128 }
  0xf1   :  { %vm130_vm0 = vcmp.eq.s32.totalorder %v125_v50, %v129_v52  ;;  %vm131_vm1 = vcmp.eq.s32.totalorder %v126_v51, %v129_v52  ;;  %v1900_v50 = vld [vmem:[#allocation10 + $0x8c] ss:$16 sps:$4 sm:$0xff]   ;;  %v1895_v51 = vld [vmem:[#allocation10 + $0x80] ss:$16 sps:$4 sm:$0xff]   ;;  %v1898_v52 = vld [vmem:[#allocation10 + $0x88] ss:$16 sps:$4 sm:$0xff]  }
  0xf2   :  { %vm1567_vm2 = vmpackc.low %vm130_vm0, %vm130_vm0 }
  0xf3   :  { %vm1565_vm3 = vmpackc.low %vm131_vm1, %vm131_vm1 }
  0xf4   :  { %1566 = vmatprep.mubr.msk.bf16.mxu0 %vm1565_vm3, %v2246_v55 }
  0xf5   :  { %1568 = vmatmul.mubr.msk.bf16.vlgmr.msra.gmra.mrb[0].mxu0 %vm1567_vm2, %v2246_v55  ;;  %v1901_v55 = vld [vmem:[#allocation10 + $0xa0] ss:$16 sps:$4 sm:$0xff]  }
  0xf6   :  { %758 = vmatpush1.bf16.msra.mxu0 %v1777_v53  ;;  %789 = vmatprep.mubr.bf16.mxu0 %v309_v25  ;;  %v1903_v53 = vld [vmem:[#allocation10 + $0xa4] ss:$16 sps:$4 sm:$0xff]   ;;  %v1954_v25 = vld [vmem:[#allocation10 + $0x1ac] ss:$16 sps:$4 sm:$0xff]  }
  0xf7   :  { %759 = vmatprep.subr.bf16.mxu0 %v1785_v54  ;;  %v1906_v54 = vld [vmem:[#allocation10 + $0xac] ss:$16 sps:$4 sm:$0xff]  }
  0xfa   :  { %760 = vmatpush1.bf16.msra.mxu0 %v1783_v56  ;;  %v1904_v56 = vld [vmem:[#allocation10 + $0xa8] ss:$16 sps:$4 sm:$0xff]  }
  0xfb   :  { %761 = vmatprep.subr.bf16.mxu0 %v1791_v57  ;;  %v1909_v57 = vld [vmem:[#allocation10 + $0xc4] ss:$16 sps:$4 sm:$0xff]  }
  0xfe   :  { %762 = vmatpush1.bf16.msra.mxu0 %v1789_v58  ;;  %v1912_v58 = vld [vmem:[#allocation10 + $0xcc] ss:$16 sps:$4 sm:$0xff]  }
  0xff   :  { %763 = vmatprep.subr.bf16.mxu0 %v1797_v59  ;;  %v1907_v59 = vld [vmem:[#allocation10 + $0xc0] ss:$16 sps:$4 sm:$0xff]  }
 0x102   :  { %764 = vmatpush1.bf16.msra.mxu0 %v1795_v60  ;;  %v1910_v60 = vld [vmem:[#allocation10 + $0xc8] ss:$16 sps:$4 sm:$0xff]  }
 0x103   :  { %765 = vmatprep.subr.bf16.mxu0 %v1803_v61  ;;  %v1915_v61 = vld [vmem:[#allocation10 + $0xe4] ss:$16 sps:$4 sm:$0xff]  }
 0x106   :  { %766 = vmatpush1.bf16.msra.mxu0 %v1801_v62  ;;  %v1918_v62 = vld [vmem:[#allocation10 + $0xec] ss:$16 sps:$4 sm:$0xff]  }
 0x107   :  { %767 = vmatprep.subr.bf16.mxu0 %v1809_v63  ;;  %v1913_v63 = vld [vmem:[#allocation10 + $0xe0] ss:$16 sps:$4 sm:$0xff]  }
 0x10a   :  { %768 = vmatpush1.bf16.msra.mxu0 %v1807_v1  ;;  %v1916_v1 = vld [vmem:[#allocation10 + $0xe8] ss:$16 sps:$4 sm:$0xff]  }
 0x10b   :  { %769 = vmatprep.subr.bf16.mxu0 %v1815_v2  ;;  %v1921_v2 = vld [vmem:[#allocation10 + $0x104] ss:$16 sps:$4 sm:$0xff]  }
 0x10e   :  { %770 = vmatpush1.bf16.msra.mxu0 %v1813_v3  ;;  %v1924_v3 = vld [vmem:[#allocation10 + $0x10c] ss:$16 sps:$4 sm:$0xff]  }
 0x10f   :  { %771 = vmatprep.subr.bf16.mxu0 %v1821_v4  ;;  %v1919_v4 = vld [vmem:[#allocation10 + $0x100] ss:$16 sps:$4 sm:$0xff]  }
 0x112   :  { %772 = vmatpush1.bf16.msra.mxu0 %v1819_v5  ;;  %v1922_v5 = vld [vmem:[#allocation10 + $0x108] ss:$16 sps:$4 sm:$0xff]  }
 0x113   :  { %773 = vmatprep.subr.bf16.mxu0 %v1827_v6  ;;  %v1927_v6 = vld [vmem:[#allocation10 + $0x124] ss:$16 sps:$4 sm:$0xff]  }
 0x116   :  { %774 = vmatpush1.bf16.msra.mxu0 %v1825_v7  ;;  %v1930_v7 = vld [vmem:[#allocation10 + $0x12c] ss:$16 sps:$4 sm:$0xff]  }
 0x117   :  { %775 = vmatprep.subr.bf16.mxu0 %v1833_v8  ;;  %v1925_v8 = vld [vmem:[#allocation10 + $0x120] ss:$16 sps:$4 sm:$0xff]  }
 0x11a   :  { %776 = vmatpush1.bf16.msra.mxu0 %v1831_v9  ;;  %v1928_v9 = vld [vmem:[#allocation10 + $0x128] ss:$16 sps:$4 sm:$0xff]  }
 0x11b   :  { %777 = vmatprep.subr.bf16.mxu0 %v1839_v10  ;;  %v1933_v10 = vld [vmem:[#allocation10 + $0x144] ss:$16 sps:$4 sm:$0xff]  }
 0x11e   :  { %778 = vmatpush1.bf16.msra.mxu0 %v1837_v11  ;;  %v1936_v11 = vld [vmem:[#allocation10 + $0x14c] ss:$16 sps:$4 sm:$0xff]  }
 0x11f   :  { %779 = vmatprep.subr.bf16.mxu0 %v1845_v12  ;;  %v1931_v12 = vld [vmem:[#allocation10 + $0x140] ss:$16 sps:$4 sm:$0xff]  }
 0x122   :  { %780 = vmatpush1.bf16.msra.mxu0 %v1843_v13  ;;  %v1934_v13 = vld [vmem:[#allocation10 + $0x148] ss:$16 sps:$4 sm:$0xff]  }
 0x123   :  { %781 = vmatprep.subr.bf16.mxu0 %v1851_v14  ;;  %v1939_v14 = vld [vmem:[#allocation10 + $0x164] ss:$16 sps:$4 sm:$0xff]  }
 0x126   :  { %782 = vmatpush1.bf16.msra.mxu0 %v1849_v15  ;;  %v1942_v15 = vld [vmem:[#allocation10 + $0x16c] ss:$16 sps:$4 sm:$0xff]  }
 0x127   :  { %783 = vmatprep.subr.bf16.mxu0 %v1857_v16  ;;  %v1937_v16 = vld [vmem:[#allocation10 + $0x160] ss:$16 sps:$4 sm:$0xff]  }
 0x12a   :  { %784 = vmatpush1.bf16.msra.mxu0 %v1855_v17  ;;  %v1940_v17 = vld [vmem:[#allocation10 + $0x168] ss:$16 sps:$4 sm:$0xff]  }
 0x12b   :  { %785 = vmatprep.subr.bf16.mxu0 %v1863_v18  ;;  %v1945_v18 = vld [vmem:[#allocation10 + $0x184] ss:$16 sps:$4 sm:$0xff]  }
 0x12e   :  { %786 = vmatpush1.bf16.msra.mxu0 %v1861_v19  ;;  %v1948_v19 = vld [vmem:[#allocation10 + $0x18c] ss:$16 sps:$4 sm:$0xff]  }
 0x12f   :  { %787 = vmatprep.subr.bf16.mxu0 %v1869_v21  ;;  %v1946_v21 = vld [vmem:[#allocation10 + $0x188] ss:$16 sps:$4 sm:$0xff]  }
 0x132   :  { %788 = vmatpush1.bf16.msra.mxu0 %v1867_v22  ;;  %v1949_v22 = vld [vmem:[#allocation10 + $0x1a0] ss:$16 sps:$4 sm:$0xff]  }
 0x133   :  { %1277 = vmatprep.subr.bf16.mxu0 %v1876_v27  ;;  %v1960_v27 = vld [vmem:[#allocation10 + $0x1cc] ss:$16 sps:$4 sm:$0xff]  }
 0x1c8   :  { %v1735_v28 = vpop.f32.mrb[0].mxu0 }
 0x1c9   :  { %v1736_v29 = vpop.f32.mrb[1].mxu0 }
 0x1ca   :  { %v1737_v30 = vadd.f32 %v1736_v29, %v1735_v28  ;;  %v1738_v31 = vpop.f32.mrb[2].mxu0  ;;  %v1955_v28 = vld [vmem:[#allocation10 + $0x1c0] ss:$16 sps:$4 sm:$0xff]   ;;  %v1958_v29 = vld [vmem:[#allocation10 + $0x1c8] ss:$16 sps:$4 sm:$0xff]  }
 0x1cb   :  { %v1739_v32 = vpop.f32.mrb[3].mxu0  ;;  %v1963_v31 = vld [vmem:[#allocation10 + $0x1e4] ss:$16 sps:$4 sm:$0xff]  }
 0x1cc   :  { %v306_v35 = vpack.c.bf16 %v1737_v30, %v1737_v30  ;;  %v826_v30 = vld [vmem:[#allocation5 + $0x8] sm:$0xff] }
 0x1cd   :  { %v1966_v32 = vld [vmem:[#allocation10 + $0x1ec] ss:$16 sps:$4 sm:$0xff]  }
 0x1ce   :  { %749 = vmatmul.mubr.bf16.vlgmr.msra.gmra.mrb[0].mxu1 %v306_v35  ;;  %790 = vmatmul.mubr.bf16.vlgmr.msra.gmra.mrb[4].mxu0 %v306_v35  ;;  %v1964_v35 = vld [vmem:[#allocation10 + $0x1e8] ss:$16 sps:$4 sm:$0xff]  }
 0x1cf   :  { %1237 = vmatpush1.bf16.msra.mxu1 %v1871_v33  ;;  %1278 = vmatpush1.bf16.msra.mxu0 %v1874_v34  ;;  %v829_v33 = vpack.c.bf16 %v826_v30, %v826_v30  ;;  %v1961_v34 = vld [vmem:[#allocation10 + $0x1e0] ss:$16 sps:$4 sm:$0xff]  }
 0x1d0   :  { %1238 = vmatprep.subr.bf16.mxu1 %v1879_v36  ;;  %1279 = vmatprep.subr.bf16.mxu0 %v1882_v37  ;;  %v2408_v36 = vshrl.u32 %v124_v49, 7  ;;  %v894_v30 = vld [vmem:[%s2491_s7] sm:$0xf]  ;;  %s2247_s7 = smov [#allocation14]  }
 0x1d1   :  { %1268 = vmatprep.mubr.bf16.mxu1 %v829_v33  ;;  %1309 = vmatprep.mubr.bf16.mxu0 %v829_v33  ;;  %s1513_s30 = sshll.u32 %s2247_s7, 4  ;;  %s1514_s30 = int_to_ptr.vmem [resolvable:$true] %s1513_s30 }
 0x1d2   :  { %v2411_v37 = vsub.s32 0, %v2408_v36  ;;  %v386_v49 = vsub.s32 2, %v2408_v36  ;;  %s2155_s17 = scalar_lea.vmem %s1514_s30, 256  ;;  %p2160_p7 = scmp.lt.s32.totalorder %s1514_s30, %s1514_s30 }
 0x1d3   :  { %1239 = vmatpush1.bf16.msra.mxu1 %v1877_v38  ;;  %1280 = vmatpush1.bf16.msra.mxu0 %v1880_v39  ;;  %v374_v38 = vld [vmem:[%s2489_s5] sm:$0xf]  ;;  %v2417_v39 = vsub.s32 1, %v2408_v36  ;;  %p2156_p6 = scmp.ne.s32.totalorder %s1514_s30, %s2155_s17  ;;  %p2161_p8 = scmp.lt.s32.totalorder %s2155_s17, %s2155_s17 }
 0x1d4   :  { %1240 = vmatprep.subr.bf16.mxu1 %v1885_v40  ;;  %1281 = vmatprep.subr.bf16.mxu0 %v1888_v41  ;;  %v379_v40 = vrot.slane %v374_v38, %v2411_v37 }
 0x1d5   :  { %v383_v41 = vrot.slane %v374_v38, %v2417_v39  ;;  %p2162_p9 = por %p2161_p8, %p2160_p7 }
 0x1d7   :  { %1241 = vmatpush1.bf16.msra.mxu1 %v1883_v42  ;;  %1282 = vmatpush1.bf16.msra.mxu0 %v1886_v43  ;;  %p2163_p10 = pnand %p2162_p9, %p2156_p6 }
 0x1d8   :  { %1242 = vmatprep.subr.bf16.mxu1 %v1891_v44  ;;  %1283 = vmatprep.subr.bf16.mxu0 %v1894_v45 }
 0x1db   :  { %1243 = vmatpush1.bf16.msra.mxu1 %v1889_v46  ;;  %1284 = vmatpush1.bf16.msra.mxu0 %v1892_v47 }
 0x1dc   :  { %1244 = vmatprep.subr.bf16.mxu1 %v1897_v48  ;;  %1285 = vmatprep.subr.bf16.mxu0 %v1900_v50 }
 0x1df   :  { %1245 = vmatpush1.bf16.msra.mxu1 %v1895_v51  ;;  %1286 = vmatpush1.bf16.msra.mxu0 %v1898_v52 }
 0x1e0   :  { %1246 = vmatprep.subr.bf16.mxu1 %v1903_v53  ;;  %1287 = vmatprep.subr.bf16.mxu0 %v1906_v54 }
 0x1e3   :  { %1247 = vmatpush1.bf16.msra.mxu1 %v1901_v55  ;;  %1288 = vmatpush1.bf16.msra.mxu0 %v1904_v56  ;;  %v390_v55 = vsub.s32 3, %v2408_v36  ;;  %v387_v56 = vrot.slane %v374_v38, %v386_v49 }
 0x1e4   :  { %1248 = vmatprep.subr.bf16.mxu1 %v1909_v57  ;;  %1289 = vmatprep.subr.bf16.mxu0 %v1912_v58 }
 0x1e5   :  { %v391_v57 = vrot.slane %v374_v38, %v390_v55 }
 0x1e7   :  { %1249 = vmatpush1.bf16.msra.mxu1 %v1907_v59  ;;  %1290 = vmatpush1.bf16.msra.mxu0 %v1910_v60 }
 0x1e8   :  { %1250 = vmatprep.subr.bf16.mxu1 %v1915_v61  ;;  %1291 = vmatprep.subr.bf16.mxu0 %v1918_v62 }
 0x1eb   :  { %1251 = vmatpush1.bf16.msra.mxu1 %v1913_v63  ;;  %1292 = vmatpush1.bf16.msra.mxu0 %v1916_v1 }
 0x1ec   :  { %1252 = vmatprep.subr.bf16.mxu1 %v1921_v2  ;;  %1293 = vmatprep.subr.bf16.mxu0 %v1924_v3 }
 0x1ef   :  { %1253 = vmatpush1.bf16.msra.mxu1 %v1919_v4  ;;  %1294 = vmatpush1.bf16.msra.mxu0 %v1922_v5  ;;  %v308_v5 = vld [vmem:[#allocation7] sm:$0xff] }
 0x1f0   :  { %1254 = vmatprep.subr.bf16.mxu1 %v1927_v6  ;;  %1295 = vmatprep.subr.bf16.mxu0 %v1930_v7 }
 0x1f3   :  { %1255 = vmatpush1.bf16.msra.mxu1 %v1925_v8  ;;  %1296 = vmatpush1.bf16.msra.mxu0 %v1928_v9 }
 0x1f4   :  { %1256 = vmatprep.subr.bf16.mxu1 %v1933_v10  ;;  %1297 = vmatprep.subr.bf16.mxu0 %v1936_v11 }
 0x1f7   :  { %1257 = vmatpush1.bf16.msra.mxu1 %v1931_v12  ;;  %1298 = vmatpush1.bf16.msra.mxu0 %v1934_v13 }
 0x1f8   :  { %1258 = vmatprep.subr.bf16.mxu1 %v1939_v14  ;;  %1299 = vmatprep.subr.bf16.mxu0 %v1942_v15  ;;  %v1969_v15 = vld [vmem:[#allocation11 + $0x4] ss:$8 sps:$4 sm:$0xff]  }
 0x1fb   :  { %1259 = vmatpush1.bf16.msra.mxu1 %v1937_v16  ;;  %1300 = vmatpush1.bf16.msra.mxu0 %v1940_v17  ;;  %v1967_v16 = vld [vmem:[#allocation11] ss:$8 sps:$4 sm:$0xff]   ;;  %v1972_v17 = vld [vmem:[#allocation11 + $0x14] ss:$8 sps:$4 sm:$0xff]  }
 0x1fc   :  { %1260 = vmatprep.subr.bf16.mxu1 %v1945_v18  ;;  %1301 = vmatprep.subr.bf16.mxu0 %v1948_v19  ;;  %v1970_v18 = vld [vmem:[#allocation11 + $0x10] ss:$8 sps:$4 sm:$0xff]   ;;  %v1975_v19 = vld [vmem:[#allocation11 + $0x24] ss:$8 sps:$4 sm:$0xff]  }
 0x1ff   :  { %1261 = vmatpush1.bf16.msra.mxu1 %v1943_v20  ;;  %1302 = vmatpush1.bf16.msra.mxu0 %v1946_v21  ;;  %v1973_v20 = vld [vmem:[#allocation11 + $0x20] ss:$8 sps:$4 sm:$0xff]   ;;  %v1978_v21 = vld [vmem:[#allocation11 + $0x34] ss:$8 sps:$4 sm:$0xff]  }
 0x200   :  { %1262 = vmatprep.subr.bf16.mxu1 %v1951_v23  ;;  %1303 = vmatprep.subr.bf16.mxu0 %v1954_v25  ;;  %v1981_v23 = vld [vmem:[#allocation11 + $0x44] ss:$8 sps:$4 sm:$0xff]   ;;  %v1984_v25 = vld [vmem:[#allocation11 + $0x54] ss:$8 sps:$4 sm:$0xff]  }
 0x203   :  { %1263 = vmatpush1.bf16.msra.mxu1 %v1949_v22  ;;  %1304 = vmatpush1.bf16.msra.mxu0 %v1952_v24  ;;  %v1976_v22 = vld [vmem:[#allocation11 + $0x30] ss:$8 sps:$4 sm:$0xff]   ;;  %v1979_v24 = vld [vmem:[#allocation11 + $0x40] ss:$8 sps:$4 sm:$0xff]  }
 0x204   :  { %1264 = vmatprep.subr.bf16.mxu1 %v1957_v26  ;;  %1305 = vmatprep.subr.bf16.mxu0 %v1960_v27  ;;  %v1987_v26 = vld [vmem:[#allocation11 + $0x64] ss:$8 sps:$4 sm:$0xff]   ;;  %v1985_v27 = vld [vmem:[#allocation11 + $0x60] ss:$8 sps:$4 sm:$0xff]  }
 0x207   :  { %1265 = vmatpush1.bf16.msra.mxu1 %v1955_v28  ;;  %1306 = vmatpush1.bf16.msra.mxu0 %v1958_v29  ;;  %v1990_v28 = vld [vmem:[#allocation11 + $0x74] ss:$8 sps:$4 sm:$0xff]   ;;  %v1988_v29 = vld [vmem:[#allocation11 + $0x70] ss:$8 sps:$4 sm:$0xff]  }
 0x208   :  { %1266 = vmatprep.subr.bf16.mxu1 %v1963_v31  ;;  %1307 = vmatprep.subr.bf16.mxu0 %v1966_v32  ;;  %v899_v31 = vrot.slane %v894_v30, %v2411_v37  ;;  %v903_v32 = vrot.slane %v894_v30, %v2417_v39 }
 0x20b   :  { %1267 = vmatpush1.bf16.msra.mxu1 %v1961_v34  ;;  %1308 = vmatpush1.bf16.msra.mxu0 %v1964_v35 }
 0x20c   :  { %1455 = vmatprep.subr.bf16.mxu1 %v1969_v15 }
 0x2a1   :  { %v750_v42 = vpop.f32.mrb[0].mxu1  ;;  %v791_v43 = vpop.f32.mrb[4].mxu0 }
 0x2a2   :  { %v751_v44 = vadd.f32 %v750_v42, %v379_v40  ;;  %v752_v45 = vpop.f32.mrb[1].mxu1  ;;  %v793_v46 = vpop.f32.mrb[5].mxu0  ;;  %v792_v58 = vadd.f32 %v791_v43, %v387_v56 }
 0x2a3   :  { %v753_v47 = vadd.f32 %v752_v45, %v383_v41  ;;  %v754_v48 = vpop.f32.mrb[2].mxu1  ;;  %v795_v50 = vpop.f32.mrb[6].mxu0  ;;  %v794_v59 = vadd.f32 %v793_v46, %v391_v57 }
 0x2a4   :  { %v1633_v51 = vmul.f32 -1.442695, %v751_v44  ;;  %v755_v52 = vpop.f32.mrb[3].mxu1  ;;  %v796_v53 = vpop.f32.mrb[7].mxu0  ;;  %v1635_v60 = vmul.f32 -1.442695, %v792_v58  ;;  %v907_v48 = vrot.slane %v894_v30, %v386_v49  ;;  %v911_v50 = vrot.slane %v894_v30, %v390_v55 }
 0x2a5   :  { %v1634_v54 = vmul.f32 -1.442695, %v753_v47 }
 0x2a6   :  { %1991 = vpow2.f32 %v1633_v51 }
 0x2a7   :  { %1993 = vpow2.f32 %v1634_v54 }
 0x2a8   :  { %1995 = vtanh.f32 %v794_v59 }
 0x2a9   :  { %1997 = vpow2.f32 %v1635_v60 }
 0x2b0   :  { %v1992_v61 = vpop.eup %1991 }
 0x2b1   :  { %v807_v62 = vadd.f32 1.0, %v1992_v61  ;;  %v1994_v63 = vpop.eup %1993 }
 0x2b2   :  { %v808_v1 = vadd.f32 1.0, %v1994_v63  ;;  %v1996_v2 = vpop.eup %1995 }
 0x2b3   :  { %1999 = vrcp.f32 %v807_v62  ;;  %v1998_v3 = vpop.eup %1997  ;;  %v828_v62 = vld [vmem:[#allocation7 + $0x8] sm:$0xff] }
 0x2b4   :  { %2001 = vrcp.f32 %v808_v1  ;;  %v809_v8 = vadd.f32 1.0, %v1998_v3 }
 0x2b6   :  { %2003 = vrcp.f32 %v809_v8 }
 0x2bd   :  { %v2000_v4 = vpop.eup %1999 }
 0x2be   :  { %v818_v6 = vmul.f32 %v2000_v4, %v1996_v2  ;;  %v2002_v7 = vpop.eup %2001 }
 0x2bf   :  { %v817_v9 = vmul.f32 %v2002_v7, %v308_v5 }
 0x2c0   :  { %v2004_v11 = vpop.eup %2003 }
 0x2c1   :  { %v819_v10 = vadd.f32 %v818_v6, %v817_v9 }
 0x2c3   :  { %2005 = vtanh.f32 %v819_v10  ;;  %823 = vst [vmem:[#allocation16] sm:$0xff] %v819_v10 }
 0x2cd   :  { %v2006_v12 = vpop.eup %2005 }
 0x2ce   :  { %v821_v13 = vmul.f32 %v2006_v12, %v2004_v11 }
 0x2d0   :  { %v824_v14 = vpack.c.bf16 %v821_v13, %v821_v13  ;;  %822 = vst [vmem:[#allocation14] sm:$0xff] %v821_v13 }
 0x2d2   :  { %1269 = vmatmul.mubr.bf16.vlgmr.msra.gmra.mrb[4].mxu1 %v824_v14  ;;  %1310 = vmatmul.mubr.bf16.vlgmr.msra.gmra.mrb[8].mxu0 %v824_v14 }
 0x2d3   :  { %1487 = vmatprep.mubr.bf16.mxu1 %v2245_v0  ;;  %1456 = vmatpush1.bf16.msra.mxu1 %v1967_v16  ;;  %v1982_v0 = vld [vmem:[#allocation11 + $0x50] ss:$8 sps:$4 sm:$0xff]  }
 0x2d4   :  { %1457 = vmatprep.subr.bf16.mxu1 %v1972_v17 }
 0x2d7   :  { %1458 = vmatpush1.bf16.msra.mxu1 %v1970_v18 }
 0x2d8   :  { %1459 = vmatprep.subr.bf16.mxu1 %v1975_v19 }
 0x2db   :  { %1460 = vmatpush1.bf16.msra.mxu1 %v1973_v20 }
 0x2dc   :  { %1461 = vmatprep.subr.bf16.mxu1 %v1978_v21 }
 0x2df   :  { %1462 = vmatpush1.bf16.msra.mxu1 %v1976_v22 }
 0x2e0   :  { %1463 = vmatprep.subr.bf16.mxu1 %v1981_v23 }
 0x2e3   :  { %1464 = vmatpush1.bf16.msra.mxu1 %v1979_v24 }
 0x2e4   :  { %1465 = vmatprep.subr.bf16.mxu1 %v1984_v25 }
 0x2e7   :  { %1466 = vmatpush1.bf16.msra.mxu1 %v1982_v0 }
 0x2e8   :  { %1467 = vmatprep.subr.bf16.mxu1 %v1987_v26 }
 0x2eb   :  { %1468 = vmatpush1.bf16.msra.mxu1 %v1985_v27 }
 0x2ec   :  { %1469 = vmatprep.subr.bf16.mxu1 %v1990_v28 }
 0x2ef   :  { %1470 = vmatpush1.bf16.msra.mxu1 %v1988_v29 }
 0x3a5   :  { %v1270_v33 = vpop.f32.mrb[4].mxu1  ;;  %v1311_v34 = vpop.f32.mrb[8].mxu0 }
 0x3a6   :  { %v1271_v35 = vadd.f32 %v1270_v33, %v899_v31  ;;  %v1272_v38 = vpop.f32.mrb[5].mxu1  ;;  %v1313_v40 = vpop.f32.mrb[9].mxu0  ;;  %v1312_v51 = vadd.f32 %v1311_v34, %v907_v48 }
 0x3a7   :  { %v1273_v41 = vadd.f32 %v1272_v38, %v903_v32  ;;  %v1274_v42 = vpop.f32.mrb[6].mxu1  ;;  %v1315_v43 = vpop.f32.mrb[10].mxu0  ;;  %v1314_v52 = vadd.f32 %v1313_v40, %v911_v50 }
 0x3a8   :  { %v1700_v44 = vmul.f32 -1.442695, %v1271_v35  ;;  %v1275_v45 = vpop.f32.mrb[7].mxu1  ;;  %v1316_v46 = vpop.f32.mrb[11].mxu0  ;;  %v1702_v53 = vmul.f32 -1.442695, %v1312_v51 }
 0x3a9   :  { %v1701_v47 = vmul.f32 -1.442695, %v1273_v41 }
 0x3aa   :  { %2007 = vpow2.f32 %v1700_v44 }
 0x3ab   :  { %2009 = vpow2.f32 %v1701_v47 }
 0x3ac   :  { %2011 = vtanh.f32 %v1314_v52 }
 0x3ad   :  { %2013 = vpow2.f32 %v1702_v53 }
 0x3b4   :  { %v2008_v54 = vpop.eup %2007 }
 0x3b5   :  { %v1327_v56 = vadd.f32 1.0, %v2008_v54  ;;  %v2010_v57 = vpop.eup %2009 }
 0x3b6   :  { %v1328_v58 = vadd.f32 1.0, %v2010_v57  ;;  %v2012_v59 = vpop.eup %2011 }
 0x3b7   :  { %2015 = vrcp.f32 %v1327_v56  ;;  %v2014_v60 = vpop.eup %2013 }
 0x3b8   :  { %2017 = vrcp.f32 %v1328_v58  ;;  %v1329_v1 = vadd.f32 1.0, %v2014_v60 }
 0x3ba   :  { %2019 = vrcp.f32 %v1329_v1 }
 0x3c1   :  { %v2016_v61 = vpop.eup %2015 }
 0x3c2   :  { %v1338_v49 = vmul.f32 %v2016_v61, %v2012_v59  ;;  %v2018_v63 = vpop.eup %2017 }
 0x3c3   :  { %v1337_v36 = vmul.f32 %v2018_v63, %v828_v62 }
 0x3c4   :  { %v2020_v2 = vpop.eup %2019 }
 0x3c5   :  { %v1339_v55 = vadd.f32 %v1338_v49, %v1337_v36 }
 0x3c7   :  { %2021 = vtanh.f32 %v1339_v55  ;;  %1345 = vst [vmem:[#allocation16 + $0x8] sm:$0xff] %v1339_v55 }
 0x3d1   :  { %v2022_v3 = vpop.eup %2021 }
 0x3d2   :  { %v1341_v4 = vmul.f32 %v2022_v3, %v2020_v2 }
 0x3d4   :  { %v1346_v5 = vpack.c.bf16 %v1341_v4, %v1341_v4  ;;  %1343 = vst [vmem:[#allocation14 + $0x8] sm:$0xff] %v1341_v4 }
 0x3d6   :  { %1488 = vmatmul.mubr.bf16.vlgmr.msra.gmra.mrb[8].mxu1 %v1346_v5 }
 0x3d7   :  { %2166 = shalt.err (!%p2163_p10)
}
 0x3d8   :  { %s2167_s3 = scalar_lea.hbm %s2495_s11, 256 }
 0x3d9   :  { %p2168_p11 = scmp.ne.s32.totalorder %s2495_s11, %s2167_s3  ;;  %p2171_p12 = scmp.lt.u32.totalorder %s2167_s3, %s2495_s11 }
 0x3db   :  { %p2173_p13 = pnand %p2171_p12, %p2168_p11 }
 0x3dd   :  { %2176 = shalt.err (!%p2173_p13)
}
 0x3de   :  { %1519 = dma.vmem_to_hbm [thread:$0]  %s1514_s30, 256, %s2495_s11, [#allocation15], %s2234_s13, %s2234_s13, %s2235_s14  }
 0x3df   :  { %s2248_s15 = smov [#allocation16]  }
 0x3e0   :  { %s1525_s4 = sshll.u32 %s2248_s15, 4  ;;  %s1526_s4 = int_to_ptr.vmem [resolvable:$true] %s1525_s4 }
 0x3e1   :  { %s2177_s18 = scalar_lea.vmem %s1526_s4, 256  ;;  %p2182_p1 = scmp.lt.s32.totalorder %s1526_s4, %s1526_s4 }
 0x3e2   :  { %p2178_p0 = scmp.ne.s32.totalorder %s1526_s4, %s2177_s18  ;;  %p2183_p2 = scmp.lt.s32.totalorder %s2177_s18, %s2177_s18 }
 0x3e4   :  { %p2184_p3 = por %p2183_p2, %p2182_p1 }
 0x3e6   :  { %p2185_p4 = pnand %p2184_p3, %p2178_p0 }
 0x3e8   :  { %2188 = shalt.err (!%p2185_p4)
}
 0x3e9   :  { %s2189_s6 = scalar_lea.hbm %s2496_s12, 256 }
 0x3ea   :  { %p2190_p5 = scmp.ne.s32.totalorder %s2496_s12, %s2189_s6  ;;  %p2193_p6 = scmp.lt.u32.totalorder %s2189_s6, %s2496_s12 }
 0x3ec   :  { %p2195_p7 = pnand %p2193_p6, %p2190_p5 }
 0x3ee   :  { %2198 = shalt.err (!%p2195_p7)
}
 0x3ef   :  { %1531 = dma.vmem_to_hbm [thread:$0]  %s1526_s4, 256, %s2496_s12, [#allocation15], %s2234_s13, %s2234_s13, %s2235_s14  }
 0x3f0   :  { %v1363_v6 = vld [vmem:[%s2493_s9] sm:$0x3]  ;;  %s2249_s7 = smov [#allocation13]  }
 0x3f1   :  { %v1368_v7 = vrot.slane %v1363_v6, %v2411_v37  ;;  %v1372_v8 = vrot.slane %v1363_v6, %v2417_v39  ;;  %s1504_s30 = sshll.u32 %s2249_s7, 4  ;;  %s1505_s30 = int_to_ptr.vmem [resolvable:$true] %s1504_s30 }
 0x3f2   :  { %s2199_s12 = scalar_lea.vmem %s1505_s30, 256  ;;  %p2204_p9 = scmp.lt.s32.totalorder %s1505_s30, %s1505_s30 }
 0x3f3   :  { %p2200_p8 = scmp.ne.s32.totalorder %s1505_s30, %s2199_s12  ;;  %p2205_p10 = scmp.lt.s32.totalorder %s2199_s12, %s2199_s12 }
 0x3f5   :  { %p2206_p11 = por %p2205_p10, %p2204_p9 }
 0x3f7   :  { %p2207_p12 = pnand %p2206_p11, %p2200_p8 }
 0x4a9   :  { %v1489_v9 = vpop.f32.mrb[8].mxu1 }
 0x4aa   :  { %v1490_v10 = vadd.f32 %v1489_v9, %v1368_v7  ;;  %v1491_v11 = vpop.f32.mrb[9].mxu1 }
 0x4ab   :  { %v1492_v12 = vadd.f32 %v1491_v11, %v1372_v8  ;;  %v1493_v13 = vpop.f32.mrb[10].mxu1 }
 0x4ac   :  { %1496 = vst [vmem:[#allocation13] sm:$0xff] %v1490_v10  ;;  %v1494_v14 = vpop.f32.mrb[11].mxu1 }
 0x4ad   :  { %1497 = vst [vmem:[#allocation13 + $0x8] sm:$0xff] %v1492_v12 }
 0x4ae   :  { %2210 = shalt.err (!%p2207_p12)
}
 0x4af   :  { %s2211_s14 = scalar_lea.hbm %s2494_s10, 256 }
 0x4b0   :  { %p2212_p13 = scmp.ne.s32.totalorder %s2494_s10, %s2211_s14  ;;  %p2215_p0 = scmp.lt.u32.totalorder %s2211_s14, %s2494_s10 }
 0x4b2   :  { %p2217_p1 = pnand %p2215_p0, %p2212_p13 }
 0x4b4   :  { %2220 = shalt.err (!%p2217_p1)
}
 0x4b5   :  { %1507 = dma.vmem_to_hbm [thread:$0]  %s1505_s30, 256, %s2494_s10, [#allocation4]  }
 0x4b6   :  { %2229 = dma.done.wait [#allocation4], 256  }
 0x4b7   :  { %2230 = vsyncadd [#allocation4], 4294967040 }
 0x4b8   :  { %2231 = dma.done.wait [#allocation15], 512  }
 0x4b9   :  { %2232 = vsyncadd [#allocation15], 4294966784 }
 0x4ba   :  { %1541 = vsyncpa [#allocation3], 1 }
 0x4bb   :  { %1542 = vsyncpa [#allocation6], 1 }
 0x4bc   :  { %1543 = vsyncpa [#allocation9], 1 }
 0x4bd   :  { %1544 = vsyncpa [#allocation12], 1 }
 0x4be   :  { %1545 = vsyncpa [#allocation4], 1 }
 0x4bf   :  { %1546 = vsyncpa [#allocation15], 1 }

</bundles_post_ra>
